<compile_context>
chip_gen: v7x
topology: tpu7x:2x2x1
jax: 0.10.0
libtpu: 0.0.40
codegen_flags: <defaults>
</compile_context>

<pallas_src>
import jax
import jax.numpy as jnp
import numpy as np
from jax.experimental import pallas as pl
from jax.experimental.pallas import tpu as pltpu


def _round_up(x, m):
    return (x + m - 1) // m * m


# ----------------------------------------------------------------------------
# Pallas kernel: fused user+item GRU (zero hidden state) + L2 normalization
# ----------------------------------------------------------------------------
def limnet_fused_gru_kernel(
    inp_ref,    # (TB, 2+uf+itf) raw inputs [user_id, item_id, ufeat, ifeat] f32
    umem_ref,   # (TB, E)   gathered user memory rows                          f32
    imem_ref,   # (TB, E)   gathered item memory rows                          f32
    w_inp_ref,  # (2+uf+itf, 6*Ep) bf16 weights (zero rows for the id cols)
    w_um_ref,   # (E, 6*Ep) bf16 weights for user-memory rows
    w_im_ref,   # (E, 6*Ep) bf16 weights for item-memory rows
    bt_ref,     # (1, 6*Ep) f32  pre-folded biases: b_ih + [b_hh_r, b_hh_z, 0]
    bhn_ref,    # (1, 2*Ep) f32  hidden bias of the n gate [b_hh_n_u | b_hh_n_i]
    o_ref,      # (TB, 2*Ep) f32 output [user_emb | item_emb], each half L2-norm'd
):
    two_ep = o_ref.shape[1]         # 2*Ep (Ep is a multiple of 128)
    ep = two_ep // 2

    # Split-K: three MXU dots instead of materializing a concatenated (B, F)
    # slab in HBM.  bf16 inputs, f32 accumulation.
    gates = jnp.dot(inp_ref[...].astype(jnp.bfloat16), w_inp_ref[...],
                    preferred_element_type=jnp.float32)
    gates = gates + jnp.dot(umem_ref[...].astype(jnp.bfloat16), w_um_ref[...],
                            preferred_element_type=jnp.float32)
    gates = gates + jnp.dot(imem_ref[...].astype(jnp.bfloat16), w_im_ref[...],
                            preferred_element_type=jnp.float32)
    gates = gates + bt_ref[...]

    # Gate column layout: [r_u r_i | z_u z_i | n_u n_i], each block Ep wide,
    # so all slice boundaries are multiples of 128 lanes.
    r = jax.nn.sigmoid(gates[:, 0:two_ep])
    z = jax.nn.sigmoid(gates[:, two_ep:2 * two_ep])
    n = jnp.tanh(gates[:, 2 * two_ep:3 * two_ep] + r * bhn_ref[...])
    h = (1.0 - z) * n               # h' = (1-z)*n + z*h with h == 0

    # Padded columns of h are exactly 0, so summing over the full Ep-wide half
    # equals summing over the real E columns.
    # 1 / max(||x||, 1e-12) == rsqrt(max(sumsq, 1e-24))  (EUP slot)
    hsq = h * h
    inv_u = jax.lax.rsqrt(
        jnp.maximum(jnp.sum(hsq[:, :ep], axis=1, keepdims=True), 1e-24))
    inv_i = jax.lax.rsqrt(
        jnp.maximum(jnp.sum(hsq[:, ep:], axis=1, keepdims=True), 1e-24))

    # Direct, 128-lane-aligned stores (no concatenate / masked partial stores).
    o_ref[:, :ep] = (h[:, :ep] * inv_u).astype(o_ref.dtype)
    o_ref[:, ep:] = (h[:, ep:] * inv_i).astype(o_ref.dtype)


def _gru_pallas(inputs, user_mem, item_mem, w_inp, w_um, w_im, b_total, b_hh_n,
                max_tile=512):
    B, in_cols = inputs.shape
    E = user_mem.shape[1]
    six_ep = w_inp.shape[1]
    two_ep = b_hh_n.shape[1]

    # Batch tile: >= 256 rows fills the v6e/v7x MXU and amortizes per-step
    # overhead; capped so VMEM stays a few MiB (fine for v7x's 64 MiB VMEM).
    TB = _round_up(B, 8) if B <= max_tile else max_tile
    grid = (pl.cdiv(B, TB),)

    row_map = lambda i: (i, 0)      # batch-tiled arrays
    const_map = lambda i: (0, 0)    # resident weights / biases

    return pl.pallas_call(
        limnet_fused_gru_kernel,
        out_shape=jax.ShapeDtypeStruct((B, two_ep), jnp.float32),
        grid=grid,
        in_specs=[
            pl.BlockSpec((TB, in_cols), row_map),
            pl.BlockSpec((TB, E), row_map),
            pl.BlockSpec((TB, E), row_map),
            pl.BlockSpec((in_cols, six_ep), const_map),
            pl.BlockSpec((E, six_ep), const_map),
            pl.BlockSpec((E, six_ep), const_map),
            pl.BlockSpec((1, six_ep), const_map),
            pl.BlockSpec((1, two_ep), const_map),
        ],
        out_specs=pl.BlockSpec((TB, two_ep), row_map),
        compiler_params=pltpu.CompilerParams(
            dimension_semantics=("parallel",)),   # v7x: split batch across 2 TCs
    )(inputs, user_mem, item_mem, w_inp, w_um, w_im, b_total, b_hh_n)


# ----------------------------------------------------------------------------
# One-time parameter fusion (outside the hot path)
# ----------------------------------------------------------------------------
def fuse_params(params, embedding_size, user_feature_size, item_feature_size):
    E = embedding_size
    uf, itf = user_feature_size, item_feature_size
    Ep = _round_up(E, 128)          # 128-lane-aligned per-half gate width

    wu = params["user_w_ih_t"]      # (F, 3E), rows in user-input column order
    wi = params["item_w_ih_t"]      # (F, 3E), rows in item-input column order

    def _pad(w):                    # (rows, E) -> (rows, Ep) with zero columns
        return jnp.pad(w, ((0, 0), (0, Ep - E)))

    def interleave(wu_blk, wi_blk):
        # (rows, 3E) x2 -> (rows, 6*Ep): [r_u r_i | z_u z_i | n_u n_i],
        # each sub-block zero-padded to Ep columns.
        return jnp.concatenate(
            [_pad(wu_blk[:, 0:E]),        _pad(wi_blk[:, 0:E]),
             _pad(wu_blk[:, E:2 * E]),    _pad(wi_blk[:, E:2 * E]),
             _pad(wu_blk[:, 2 * E:3 * E]), _pad(wi_blk[:, 2 * E:3 * E])],
            axis=1)

    # user-cell row blocks (user input order: [umem(E), ufeat(uf), imem(E), ifeat(itf)])
    wu_umem = wu[0:E]
    wu_ufeat = wu[E:E + uf]
    wu_imem = wu[E + uf:2 * E + uf]
    wu_ifeat = wu[2 * E + uf:]
    # item-cell row blocks (item input order: [imem(E), ifeat(itf), umem(E), ufeat(uf)])
    wi_imem = wi[0:E]
    wi_ifeat = wi[E:E + itf]
    wi_umem = wi[E + itf:2 * E + itf]
    wi_ufeat = wi[2 * E + itf:]

    # Weight matrix applied to the raw `inputs` tensor: rows for
    # [user_id, item_id, user_features, item_features]; the two id columns get
    # zero rows so `inputs` can be streamed to the kernel unsliced.
    w_inputs = jnp.concatenate(
        [jnp.zeros((2, 6 * Ep), jnp.float32),
         interleave(wu_ufeat, wi_ufeat),
         interleave(wu_ifeat, wi_ifeat)], axis=0)          # (2+uf+itf, 6Ep)
    w_umem = interleave(wu_umem, wi_umem)                  # (E, 6Ep)
    w_imem = interleave(wu_imem, wi_imem)                  # (E, 6Ep)

    biu, bhu = params["user_b_ih"], params["user_b_hh"]    # (1, 3E)
    bii, bhi = params["item_b_ih"], params["item_b_hh"]

    # b_total = b_ih + [b_hh_r, b_hh_z, 0], interleaved+padded like the weights.
    bu_total = jnp.concatenate(
        [biu[:, :2 * E] + bhu[:, :2 * E], biu[:, 2 * E:]], axis=1)
    bi_total = jnp.concatenate(
        [bii[:, :2 * E] + bhi[:, :2 * E], bii[:, 2 * E:]], axis=1)
    b_total = interleave(bu_total, bi_total)               # (1, 6Ep)
    b_hh_n = jnp.concatenate(
        [_pad(bhu[:, 2 * E:]), _pad(bhi[:, 2 * E:])], axis=1)  # (1, 2Ep)

    return {
        "w_inputs": w_inputs.astype(jnp.bfloat16),
        "w_umem":   w_umem.astype(jnp.bfloat16),
        "w_imem":   w_imem.astype(jnp.bfloat16),
        "b_total":  b_total.astype(jnp.float32),
        "b_hh_n":   b_hh_n.astype(jnp.float32),
    }


# ----------------------------------------------------------------------------
# LimnetLayer forward (functional): gather memory -> Pallas GRU -> scatter back
# ----------------------------------------------------------------------------
def limnet_layer_forward(inputs, user_memory, item_memory, fused_params,
                         user_feature_size, item_feature_size, embedding_size):
    """
    inputs:       (B, 2 + user_feature_size + item_feature_size) float32
                  cols: [user_id, item_id, user_features..., item_features...]
    user_memory:  (B, num_users, E) float32   (donated / updated in place)
    item_memory:  (B, num_items, E) float32   (donated / updated in place)
    returns: (output, new_user_memory, new_item_memory)
      output: (B, 2 + 2E) = [user_id, item_id, user_emb, item_emb]
    """
    del user_feature_size, item_feature_size  # folded into the fused weights
    B = inputs.shape[0]
    E = embedding_size
    Ep = fused_params["b_hh_n"].shape[1] // 2
    batch_idx = jnp.arange(B)

    # extract_inputs (only ids; features go to the kernel inside `inputs`)
    user_ids = inputs[:, 0].astype(jnp.int32)
    item_ids = inputs[:, 1].astype(jnp.int32)

    # gather per-batch memory rows
    # TODO(synk): at large table sizes, fuse this gather (and the scatter below)
    # into the kernel via PrefetchScalarGridSpec + memory_space=pl.ANY per-row
    # DMA; at these shapes buffer donation + XLA's in-place scatter suffices.
    user_mem = user_memory[batch_idx, user_ids]   # (B, E)
    item_mem = item_memory[batch_idx, item_ids]   # (B, E)

    emb = _gru_pallas(inputs, user_mem, item_mem,
                      fused_params["w_inputs"], fused_params["w_umem"],
                      fused_params["w_imem"], fused_params["b_total"],
                      fused_params["b_hh_n"])     # (B, 2*Ep) lane-dense slab

    new_user_emb = emb[:, :E]
    new_item_emb = emb[:, Ep:Ep + E]

    # scatter updated embeddings back into (donated) memory tables
    new_user_memory = user_memory.at[batch_idx, user_ids].set(new_user_emb)
    new_item_memory = item_memory.at[batch_idx, item_ids].set(new_item_emb)

    # torch.hstack promotes the long ids to float alongside the embeddings
    output = jnp.concatenate(
        [user_ids[:, None].astype(jnp.float32),
         item_ids[:, None].astype(jnp.float32),
         new_user_emb, new_item_emb], axis=1)
    return output, new_user_memory, new_item_memory


# ----------------------------------------------------------------------------
# Deterministic parameter init (matches torch.nn.GRUCell shapes / init range)
# ----------------------------------------------------------------------------
def init_params(key, input_size, embedding_size):
    stdv = 1.0 / jnp.sqrt(embedding_size)
    keys = jax.random.split(key, 6)

    def u(k, shape):
        return jax.random.uniform(k, shape, jnp.float32, -stdv, stdv)

    # torch GRUCell weight_ih: (3E, input_size); store transposed for x @ W^T
    return {
        "user_w_ih_t": u(keys[0], (input_size, 3 * embedding_size)),
        "user_b_ih":   u(keys[1], (1, 3 * embedding_size)),
        "user_b_hh":   u(keys[2], (1, 3 * embedding_size)),
        "item_w_ih_t": u(keys[3], (input_size, 3 * embedding_size)),
        "item_b_ih":   u(keys[4], (1, 3 * embedding_size)),
        "item_b_hh":   u(keys[5], (1, 3 * embedding_size)),
        # weight_hh omitted: hidden state is always zero in this module
        # (Sequential passes no hidden to GRUCell), so W_hh @ h == 0.
    }


# ----------------------------------------------------------------------------
# Pure-JAX reference (un-fused, follows the torch math literally)
# ----------------------------------------------------------------------------
def reference_forward(inputs, user_memory, item_memory, params,
                      user_feature_size, item_feature_size, embedding_size):
    E = embedding_size
    B = inputs.shape[0]
    batch_idx = jnp.arange(B)
    user_ids = inputs[:, 0].astype(jnp.int32)
    item_ids = inputs[:, 1].astype(jnp.int32)
    user_features = inputs[:, 2:2 + user_feature_size]
    item_features = inputs[:, 2 + user_feature_size:]
    user_mem = user_memory[batch_idx, user_ids]
    item_mem = item_memory[batch_idx, item_ids]
    user_inputs = jnp.concatenate(
        [user_mem, user_features, item_mem, item_features], axis=1)
    item_inputs = jnp.concatenate(
        [item_mem, item_features, user_mem, user_features], axis=1)

    def gru(xv, w_t, b_ih, b_hh):
        g = xv @ w_t + b_ih
        i_r, i_z, i_n = g[:, :E], g[:, E:2 * E], g[:, 2 * E:]
        h_r, h_z, h_n = b_hh[:, :E], b_hh[:, E:2 * E], b_hh[:, 2 * E:]
        r = jax.nn.sigmoid(i_r + h_r)
        z = jax.nn.sigmoid(i_z + h_z)
        n = jnp.tanh(i_n + r * h_n)
        h = (1.0 - z) * n
        norm = jnp.sqrt(jnp.sum(h * h, axis=1, keepdims=True))
        return h / jnp.maximum(norm, 1e-12)

    ue = gru(user_inputs, params["user_w_ih_t"],
             params["user_b_ih"], params["user_b_hh"])
    ie = gru(item_inputs, params["item_w_ih_t"],
             params["item_b_ih"], params["item_b_hh"])
    return jnp.concatenate(
        [user_ids[:, None].astype(jnp.float32),
         item_ids[:, None].astype(jnp.float32), ue, ie], axis=1)


if __name__ == "__main__":
    # Small shapes consistent with the module's forward
    batch = 8
    embedding_size = 32
    user_feature_size = 8
    item_feature_size = 8
    num_users = 10
    num_items = 12
    input_size = (embedding_size + user_feature_size
                  + embedding_size + item_feature_size)

    key = jax.random.PRNGKey(0)
    k_par, k_uid, k_iid, k_uf, k_if, k_um, k_im = jax.random.split(key, 7)

    params = init_params(k_par, input_size, embedding_size)
    fused = fuse_params(params, embedding_size,
                        user_feature_size, item_feature_size)

    user_ids = jax.random.randint(k_uid, (batch,), 0, num_users)
    item_ids = jax.random.randint(k_iid, (batch,), 0, num_items)
    user_features = jax.random.normal(k_uf, (batch, user_feature_size), jnp.float32)
    item_features = jax.random.normal(k_if, (batch, item_feature_size), jnp.float32)

    inputs = jnp.concatenate(
        [user_ids[:, None].astype(jnp.float32),
         item_ids[:, None].astype(jnp.float32),
         user_features, item_features], axis=1)  # (B, 2 + uf + if)

    user_memory = jax.random.normal(
        k_um, (batch, num_users, embedding_size), jnp.float32)
    item_memory = jax.random.normal(
        k_im, (batch, num_items, embedding_size), jnp.float32)

    # Reference computed BEFORE the fused call (the fused call donates the
    # memory tables, invalidating the input buffers).
    ref_out = reference_forward(
        inputs, user_memory, item_memory, params,
        user_feature_size, item_feature_size, embedding_size)
    ref_out = np.asarray(jax.block_until_ready(ref_out))

    fwd = jax.jit(
        limnet_layer_forward,
        static_argnames=("user_feature_size", "item_feature_size",
                         "embedding_size"),
        donate_argnums=(1, 2),  # update memory tables in place
    )
    output, new_user_memory, new_item_memory = fwd(
        inputs, user_memory, item_memory, fused,
        user_feature_size=user_feature_size,
        item_feature_size=item_feature_size,
        embedding_size=embedding_size)
    jax.block_until_ready((output, new_user_memory, new_item_memory))

    assert output.shape == (batch, 2 + 2 * embedding_size)
    assert new_user_memory.shape == (batch, num_users, embedding_size)
    assert new_item_memory.shape == (batch, num_items, embedding_size)
    out_np = np.asarray(output)
    assert np.all(np.isfinite(out_np))
    # Fused bf16-MXU kernel vs literal torch-style f32 reference (tolerance
    # covers bf16 MXU input rounding, same as default-precision f32 dots).
    assert np.allclose(out_np, ref_out, rtol=2e-2, atol=2e-2)

    print("KERNEL_OK")
</pallas_src>

<mosaic_0001>
module attributes {stable_mosaic.version = 11 : i64} {
  func.func @limnet_fused_gru_kernel(%arg0: i32, %arg1: memref<8x18xf32, #tpu.memory_space<vmem>>, %arg2: memref<8x32xf32, #tpu.memory_space<vmem>>, %arg3: memref<8x32xf32, #tpu.memory_space<vmem>>, %arg4: memref<18x768xbf16, #tpu.memory_space<vmem>>, %arg5: memref<32x768xbf16, #tpu.memory_space<vmem>>, %arg6: memref<32x768xbf16, #tpu.memory_space<vmem>>, %arg7: memref<1x768xf32, #tpu.memory_space<vmem>>, %arg8: memref<1x256xf32, #tpu.memory_space<vmem>>, %arg9: memref<8x256xf32, #tpu.memory_space<vmem>>) attributes {dimension_semantics = [#tpu.dimension_semantics<parallel>], iteration_bounds = array<i64: 1>, scalar_prefetch = 0 : i64, scratch_operands = 0 : i64, tpu.core_type = #tpu.core_type<tc>, window_params = [{transform_indices = @transform_0, window_bounds = array<i64: 8, 18>}, {transform_indices = @transform_1, window_bounds = array<i64: 8, 32>}, {transform_indices = @transform_2, window_bounds = array<i64: 8, 32>}, {pipeline_mode = #tpu.pipeline_mode<synchronous>, transform_indices = @transform_3, window_bounds = array<i64: 18, 768>}, {pipeline_mode = #tpu.pipeline_mode<synchronous>, transform_indices = @transform_4, window_bounds = array<i64: 32, 768>}, {pipeline_mode = #tpu.pipeline_mode<synchronous>, transform_indices = @transform_5, window_bounds = array<i64: 32, 768>}, {pipeline_mode = #tpu.pipeline_mode<synchronous>, transform_indices = @transform_6, window_bounds = array<i64: 1, 768>}, {pipeline_mode = #tpu.pipeline_mode<synchronous>, transform_indices = @transform_7, window_bounds = array<i64: 1, 256>}, {transform_indices = @transform_8, window_bounds = array<i64: 8, 256>}]} {
    %c0 = arith.constant 0 : index
    %c0_0 = arith.constant 0 : index
    %0 = vector.load %arg1[%c0, %c0_0] : memref<8x18xf32, #tpu.memory_space<vmem>>, vector<8x18xf32>
    %1 = arith.truncf %0 : vector<8x18xf32> to vector<8x18xbf16>
    %c0_1 = arith.constant 0 : index
    %c0_2 = arith.constant 0 : index
    %2 = vector.load %arg4[%c0_1, %c0_2] : memref<18x768xbf16, #tpu.memory_space<vmem>>, vector<18x768xbf16>
    %cst = arith.constant dense<0.000000e+00> : vector<8x768xf32>
    %3 = tpu.matmul %1, %2, %cst {dimension_numbers = #tpu.dot_dimension_numbers<[1], [0], [0], [1], [0, 0, 1, 1], [], []>} : vector<8x18xbf16>, vector<18x768xbf16>, vector<8x768xf32> -> vector<8x768xf32>
    %c0_3 = arith.constant 0 : index
    %c0_4 = arith.constant 0 : index
    %4 = vector.load %arg2[%c0_3, %c0_4] : memref<8x32xf32, #tpu.memory_space<vmem>>, vector<8x32xf32>
    %5 = arith.truncf %4 : vector<8x32xf32> to vector<8x32xbf16>
    %c0_5 = arith.constant 0 : index
    %c0_6 = arith.constant 0 : index
    %6 = vector.load %arg5[%c0_5, %c0_6] : memref<32x768xbf16, #tpu.memory_space<vmem>>, vector<32x768xbf16>
    %cst_7 = arith.constant dense<0.000000e+00> : vector<8x768xf32>
    %7 = tpu.matmul %5, %6, %cst_7 {dimension_numbers = #tpu.dot_dimension_numbers<[1], [0], [0], [1], [0, 0, 1, 1], [], []>} : vector<8x32xbf16>, vector<32x768xbf16>, vector<8x768xf32> -> vector<8x768xf32>
    %8 = arith.addf %3, %7 : vector<8x768xf32>
    %c0_8 = arith.constant 0 : index
    %c0_9 = arith.constant 0 : index
    %9 = vector.load %arg3[%c0_8, %c0_9] : memref<8x32xf32, #tpu.memory_space<vmem>>, vector<8x32xf32>
    %10 = arith.truncf %9 : vector<8x32xf32> to vector<8x32xbf16>
    %c0_10 = arith.constant 0 : index
    %c0_11 = arith.constant 0 : index
    %11 = vector.load %arg6[%c0_10, %c0_11] : memref<32x768xbf16, #tpu.memory_space<vmem>>, vector<32x768xbf16>
    %cst_12 = arith.constant dense<0.000000e+00> : vector<8x768xf32>
    %12 = tpu.matmul %10, %11, %cst_12 {dimension_numbers = #tpu.dot_dimension_numbers<[1], [0], [0], [1], [0, 0, 1, 1], [], []>} : vector<8x32xbf16>, vector<32x768xbf16>, vector<8x768xf32> -> vector<8x768xf32>
    %13 = arith.addf %8, %12 : vector<8x768xf32>
    %c0_13 = arith.constant 0 : index
    %c0_14 = arith.constant 0 : index
    %14 = vector.load %arg7[%c0_13, %c0_14] : memref<1x768xf32, #tpu.memory_space<vmem>>, vector<1x768xf32>
    %15 = vector.broadcast %14 : vector<1x768xf32> to vector<8x768xf32>
    %16 = arith.addf %13, %15 : vector<8x768xf32>
    %17 = vector.extract_strided_slice %16 {offsets = [0, 0], sizes = [8, 256], strides = [1, 1]} : vector<8x768xf32> to vector<8x256xf32>
    %18 = arith.negf %17 : vector<8x256xf32>
    %19 = math.exp %18 : vector<8x256xf32>
    %cst_15 = arith.constant 1.000000e+00 : f32
    %20 = vector.broadcast %cst_15 : f32 to vector<8x256xf32>
    %21 = arith.addf %20, %19 : vector<8x256xf32>
    %22 = arith.divf %20, %21 : vector<8x256xf32>
    %23 = vector.extract_strided_slice %16 {offsets = [0, 256], sizes = [8, 256], strides = [1, 1]} : vector<8x768xf32> to vector<8x256xf32>
    %24 = arith.negf %23 : vector<8x256xf32>
    %25 = math.exp %24 : vector<8x256xf32>
    %cst_16 = arith.constant 1.000000e+00 : f32
    %26 = vector.broadcast %cst_16 : f32 to vector<8x256xf32>
    %27 = arith.addf %26, %25 : vector<8x256xf32>
    %28 = arith.divf %26, %27 : vector<8x256xf32>
    %29 = vector.extract_strided_slice %16 {offsets = [0, 512], sizes = [8, 256], strides = [1, 1]} : vector<8x768xf32> to vector<8x256xf32>
    %c0_17 = arith.constant 0 : index
    %c0_18 = arith.constant 0 : index
    %30 = vector.load %arg8[%c0_17, %c0_18] : memref<1x256xf32, #tpu.memory_space<vmem>>, vector<1x256xf32>
    %31 = vector.broadcast %30 : vector<1x256xf32> to vector<8x256xf32>
    %32 = arith.mulf %22, %31 : vector<8x256xf32>
    %33 = arith.addf %29, %32 : vector<8x256xf32>
    %34 = math.tanh %33 : vector<8x256xf32>
    %cst_19 = arith.constant 1.000000e+00 : f32
    %35 = vector.broadcast %cst_19 : f32 to vector<8x256xf32>
    %36 = arith.subf %35, %28 : vector<8x256xf32>
    %37 = arith.mulf %36, %34 : vector<8x256xf32>
    %38 = arith.mulf %37, %37 : vector<8x256xf32>
    %39 = vector.extract_strided_slice %38 {offsets = [0, 0], sizes = [8, 128], strides = [1, 1]} : vector<8x256xf32> to vector<8x128xf32>
    %cst_20 = arith.constant dense<0.000000e+00> : vector<8xf32>
    %40 = vector.multi_reduction <add>, %39, %cst_20 [1] : vector<8x128xf32> to vector<8xf32>
    %41 = vector.shape_cast %40 : vector<8xf32> to vector<8x1xf32>
    %cst_21 = arith.constant 1.000000e-24 : f32
    %42 = vector.broadcast %cst_21 : f32 to vector<8x1xf32>
    %43 = arith.maximumf %41, %42 : vector<8x1xf32>
    %44 = math.rsqrt %43 : vector<8x1xf32>
    %45 = vector.extract_strided_slice %38 {offsets = [0, 128], sizes = [8, 128], strides = [1, 1]} : vector<8x256xf32> to vector<8x128xf32>
    %cst_22 = arith.constant dense<0.000000e+00> : vector<8xf32>
    %46 = vector.multi_reduction <add>, %45, %cst_22 [1] : vector<8x128xf32> to vector<8xf32>
    %47 = vector.shape_cast %46 : vector<8xf32> to vector<8x1xf32>
    %cst_23 = arith.constant 1.000000e-24 : f32
    %48 = vector.broadcast %cst_23 : f32 to vector<8x1xf32>
    %49 = arith.maximumf %47, %48 : vector<8x1xf32>
    %50 = math.rsqrt %49 : vector<8x1xf32>
    %51 = vector.extract_strided_slice %37 {offsets = [0, 0], sizes = [8, 128], strides = [1, 1]} : vector<8x256xf32> to vector<8x128xf32>
    %52 = vector.broadcast %44 : vector<8x1xf32> to vector<8x128xf32>
    %53 = arith.mulf %51, %52 : vector<8x128xf32>
    %c0_24 = arith.constant 0 : index
    %c0_25 = arith.constant 0 : index
    %54 = vector.load %arg9[%c0_24, %c0_25] : memref<8x256xf32, #tpu.memory_space<vmem>>, vector<8x128xf32>
    tpu.vector_store %arg9[%c0_24, %c0_25], %53 {strides = array<i32>} : memref<8x256xf32, #tpu.memory_space<vmem>>, vector<8x128xf32>,
    %55 = vector.extract_strided_slice %37 {offsets = [0, 128], sizes = [8, 128], strides = [1, 1]} : vector<8x256xf32> to vector<8x128xf32>
    %56 = vector.broadcast %50 : vector<8x1xf32> to vector<8x128xf32>
    %57 = arith.mulf %55, %56 : vector<8x128xf32>
    %c0_26 = arith.constant 0 : index
    %c128 = arith.constant 128 : index
    %58 = vector.load %arg9[%c0_26, %c128] : memref<8x256xf32, #tpu.memory_space<vmem>>, vector<8x128xf32>
    tpu.vector_store %arg9[%c0_26, %c128], %57 {strides = array<i32>} : memref<8x256xf32, #tpu.memory_space<vmem>>, vector<8x128xf32>,
    return
  }
  func.func @transform_0(%arg0: i32) -> (i32, i32) {
    %c0_i32 = arith.constant 0 : i32
    %c0_i32_0 = arith.constant 0 : i32
    return %arg0, %c0_i32 : i32, i32
  }
  func.func @transform_1(%arg0: i32) -> (i32, i32) {
    %c0_i32 = arith.constant 0 : i32
    %c0_i32_0 = arith.constant 0 : i32
    return %arg0, %c0_i32 : i32, i32
  }
  func.func @transform_2(%arg0: i32) -> (i32, i32) {
    %c0_i32 = arith.constant 0 : i32
    %c0_i32_0 = arith.constant 0 : i32
    return %arg0, %c0_i32 : i32, i32
  }
  func.func @transform_3(%arg0: i32) -> (i32, i32) {
    %c0_i32 = arith.constant 0 : i32
    %c0_i32_0 = arith.constant 0 : i32
    %c0_i32_1 = arith.constant 0 : i32
    return %c0_i32, %c0_i32_0 : i32, i32
  }
  func.func @transform_4(%arg0: i32) -> (i32, i32) {
    %c0_i32 = arith.constant 0 : i32
    %c0_i32_0 = arith.constant 0 : i32
    %c0_i32_1 = arith.constant 0 : i32
    return %c0_i32, %c0_i32_0 : i32, i32
  }
  func.func @transform_5(%arg0: i32) -> (i32, i32) {
    %c0_i32 = arith.constant 0 : i32
    %c0_i32_0 = arith.constant 0 : i32
    %c0_i32_1 = arith.constant 0 : i32
    return %c0_i32, %c0_i32_0 : i32, i32
  }
  func.func @transform_6(%arg0: i32) -> (i32, i32) {
    %c0_i32 = arith.constant 0 : i32
    %c0_i32_0 = arith.constant 0 : i32
    %c0_i32_1 = arith.constant 0 : i32
    return %c0_i32, %c0_i32_0 : i32, i32
  }
  func.func @transform_7(%arg0: i32) -> (i32, i32) {
    %c0_i32 = arith.constant 0 : i32
    %c0_i32_0 = arith.constant 0 : i32
    %c0_i32_1 = arith.constant 0 : i32
    return %c0_i32, %c0_i32_0 : i32, i32
  }
  func.func @transform_8(%arg0: i32) -> (i32, i32) {
    %c0_i32 = arith.constant 0 : i32
    %c0_i32_0 = arith.constant 0 : i32
    return %arg0, %c0_i32 : i32, i32
  }
}

</mosaic_0001>

<bundles_post_ra>
// kernel: limnet_layer_forward.1
= control target key start
LH: loop header
LB: loop body
LE: loop exit
PB: predicated region body
PF: predicated region fallthrough
CT: control target
= control target key end

     0   :  { %13 = vsyncpa [#allocation3], 0  ;;  %s1114_s0 = inlined_call_operand.vmem [shape: f32[8,18], index: 0, kind: input, shape index: {}]   ;;  %s1115_s1 = inlined_call_operand.vmem [shape: f32[8,32], index: 1, kind: input, shape index: {}]   ;;  %s1116_s2 = inlined_call_operand.vmem [shape: f32[8,32], index: 2, kind: input, shape index: {}]   ;;  %s1117_s3 = inlined_call_operand.hbm [shape: bf16[18,768], index: 3, kind: input, shape index: {}]   ;;  %s1118_s4 = inlined_call_operand.vmem [shape: bf16[32,768], index: 4, kind: input, shape index: {}]   ;;  %s1119_s5 = inlined_call_operand.hbm [shape: bf16[32,768], index: 5, kind: input, shape index: {}]   ;;  %s1120_s6 = inlined_call_operand.vmem [shape: f32[1,768], index: 6, kind: input, shape index: {}]   ;;  %s1121_s7 = inlined_call_operand.vmem [shape: f32[1,256], index: 7, kind: input, shape index: {}]   ;;  %s1122_s8 = inlined_call_operand.vmem [shape: f32[8,256], index: 8, kind: output, shape index: {}]  }
   0x1   :  { %14 = vsyncpa [#allocation5], 0  ;;  %s951_s27 = smov [#allocation2]   ;;  %s903_s9 = scalar_lea.hbm %s1117_s3, 1152 }
   0x2   :  { %s26_s28 = sshll.u32 %s951_s27, 4  ;;  %p904_p0 = scmp.ne.s32.totalorder %s1117_s3, %s903_s9  ;;  %s27_s28 = int_to_ptr.vmem [resolvable:$true] %s26_s28 }
   0x3   :  { %p907_p1 = scmp.lt.u32.totalorder %s903_s9, %s1117_s3 }
   0x5   :  { %p909_p2 = pnand %p907_p1, %p904_p0 }
   0x7   :  { %912 = shalt.err (!%p909_p2)
}
   0x8   :  { %s913_s14 = scalar_lea.vmem %s27_s28, 1152  ;;  %p918_p4 = scmp.lt.s32.totalorder %s27_s28, %s27_s28 }
   0x9   :  { %p914_p3 = scmp.ne.s32.totalorder %s27_s28, %s913_s14  ;;  %p919_p5 = scmp.lt.s32.totalorder %s913_s14, %s913_s14 }
   0xb   :  { %p920_p6 = por %p919_p5, %p918_p4 }
   0xd   :  { %p921_p7 = pnand %p920_p6, %p914_p3 }
   0xf   :  { %924 = shalt.err (!%p921_p7)
}
  0x10   :  { %s952_s15 = smov 384   ;;  %s953_s16 = smov 24  }
  0x11   :  { %32 = dma.hbm_to_vmem [thread:$0]  %s1117_s3, 1152, %s27_s28, [#allocation3], %s952_s15, %s952_s15, %s953_s16  }
  0x12   :  { %s954_s19 = smov [#allocation4]   ;;  %s925_s23 = scalar_lea.hbm %s1119_s5, 1536 }
  0x13   :  { %s40_s20 = sshll.u32 %s954_s19, 4  ;;  %p926_p8 = scmp.ne.s32.totalorder %s1119_s5, %s925_s23  ;;  %s41_s20 = int_to_ptr.vmem [resolvable:$true] %s40_s20 }
  0x14   :  { %p929_p9 = scmp.lt.u32.totalorder %s925_s23, %s1119_s5 }
  0x16   :  { %p931_p10 = pnand %p929_p9, %p926_p8 }
  0x18   :  { %934 = shalt.err (!%p931_p10)
}
  0x19   :  { %s935_s29 = scalar_lea.vmem %s41_s20, 1536  ;;  %p940_p12 = scmp.lt.s32.totalorder %s41_s20, %s41_s20 }
  0x1a   :  { %p936_p11 = scmp.ne.s32.totalorder %s41_s20, %s935_s29  ;;  %p941_p13 = scmp.lt.s32.totalorder %s935_s29, %s935_s29 }
  0x1c   :  { %p942_p0 = por %p941_p13, %p940_p12 }
  0x1e   :  { %p943_p1 = pnand %p942_p0, %p936_p11 }
  0x20   :  { %946 = shalt.err (!%p943_p1)
}
  0x21   :  { %46 = dma.hbm_to_vmem [thread:$0]  %s1119_s5, 1536, %s41_s20, [#allocation5], %s952_s15, %s952_s15, %s953_s16  }
  0x22   :  { %947 = dma.done.wait [#allocation3], 1152  }
  0x23   :  { %948 = vsyncadd [#allocation3], 4294966144 }
  0x24   :  { %949 = dma.done.wait [#allocation5], 1536  }
  0x25   :  { %950 = vsyncadd [#allocation5], 4294965760  ;;  %v955_v0 = vmov 0   ;;  %v828_v1 = vld [vmem:[%s1118_s4 + $0x4] ss:$24 sps:$4 sm:$0xff]   ;;  %vm143_vm0 = vcmask 261120  }
  0x26   :  { %179 = vmatprep.mubr.bf16.mxu0 %v955_v0  ;;  %220 = vmatprep.mubr.bf16.mxu1 %v955_v0  ;;  %v830_v2 = vld [vmem:[%s1118_s4 + $0xc] ss:$24 sps:$4 sm:$0xff]   ;;  %v832_v3 = vld [vmem:[%s1118_s4] ss:$24 sps:$4 sm:$0xff]   ;;  %v836_v6 = vld [vmem:[%s1118_s4 + $0x3c] ss:$24 sps:$4 sm:$0xff]  }
  0x27   :  { %147 = vmatprep.subr.bf16.mxu0 %v828_v1  ;;  %v833_v4 = vld [vmem:[%s1118_s4 + $0x8] ss:$24 sps:$4 sm:$0xff]   ;;  %188 = vmatprep.subr.bf16.mxu1 %v830_v2  ;;  %v834_v5 = vld [vmem:[%s1118_s4 + $0x34] ss:$24 sps:$4 sm:$0xff]   ;;  %v839_v8 = vld [vmem:[%s1118_s4 + $0x38] ss:$24 sps:$4 sm:$0xff]  }
  0x28   :  { %148 = vmatpush1.bf16.msra.mxu0 %v832_v3  ;;  %189 = vmatpush1.bf16.msra.mxu1 %v833_v4  ;;  %v838_v7 = vld [vmem:[%s1118_s4 + $0x30] ss:$24 sps:$4 sm:$0xff]   ;;  %v69_v9 = vld [vmem:[%s1115_s1] sm:$0xff]  ;;  %v842_v11 = vld [vmem:[%s1118_s4 + $0x14] ss:$24 sps:$4 sm:$0xff]   ;;  %vm319_vm1 = vcmask 1040384   ;;  %v669_v3 = vlaneseq }
  0x29   :  { %149 = vmatprep.subr.bf16.mxu0 %v834_v5  ;;  %190 = vmatprep.subr.bf16.mxu1 %v836_v6  ;;  %v840_v10 = vld [vmem:[%s1118_s4 + $0x10] ss:$24 sps:$4 sm:$0xff]   ;;  %v70_v12 = vpack.c.bf16 %v69_v9, %v69_v9  ;;  %v843_v13 = vld [vmem:[#allocation2] ss:$24 sps:$4 sm:$0xff]   ;;  %v845_v14 = vld [vmem:[#allocation2 + $0x4] ss:$24 sps:$4 sm:$0xff]  }
  0x2a   :  { %v848_v15 = vld [vmem:[%s1118_s4 + $0x44] ss:$24 sps:$4 sm:$0xff]   ;;  %v66_v16 = vld [vmem:[#allocation2 + $0x30] sm:$0x11]  ;;  %v846_v19 = vld [vmem:[%s1118_s4 + $0x40] ss:$24 sps:$4 sm:$0xff]  }
  0x2b   :  { %v793_v17 = vcombine.high %v66_v16, %v66_v16  ;;  %v792_v18 = vcombine.low %v66_v16, %v66_v16  ;;  %v58_v20 = vld [vmem:[%s1114_s0] sm:$0xff]  ;;  %v856_v23 = vld [vmem:[#allocation2 + $0x14] ss:$24 sps:$4 sm:$0xff]   ;;  %v67_v24 = vld [vmem:[#allocation2 + $0x38] sm:$0x11]  ;;  %vm315_vm2 = vcmask 146432  }
  0x2c   :  { %150 = vmatpush1.bf16.msra.mxu0 %v838_v7  ;;  %191 = vmatpush1.bf16.msra.mxu1 %v839_v8  ;;  %v853_v21 = vld [vmem:[#allocation2 + $0xc] ss:$24 sps:$4 sm:$0xff]   ;;  %v59_v26 = vpack.c.bf16 %v58_v20, %v58_v20  ;;  %v851_v27 = vld [vmem:[#allocation2 + $0x8] ss:$24 sps:$4 sm:$0xff]   ;;  %v795_v29 = vcombine.high %v67_v24, %v67_v24  ;;  %v794_v31 = vcombine.low %v67_v24, %v67_v24  ;;  %v869_v39 = vld [vmem:[#allocation4 + $0x34] ss:$24 sps:$4 sm:$0xff]  }
  0x2d   :  { %229 = vmatprep.subr.bf16.mxu0 %v842_v11  ;;  %338 = vmatprep.subr.bf16.mxu1 %v845_v14  ;;  %v321_v22 = vsel %vm319_vm1, %v792_v18, 0  ;;  %v68_v25 = vld [vmem:[#allocation2 + $0x40] sm:$0x11]  ;;  %v854_v28 = vld [vmem:[#allocation2 + $0x10] ss:$24 sps:$4 sm:$0xff]   ;;  %v1094_v4 = vshrl.u32 %v669_v3, 7 }
  0x2e   :  { %v797_v30 = vcombine.high %v68_v25, %v68_v25  ;;  %v796_v32 = vcombine.low %v68_v25, %v68_v25  ;;  %v863_v33 = vld [vmem:[#allocation4 + $0x4] ss:$24 sps:$4 sm:$0xff]   ;;  %v327_v34 = vsel %vm319_vm1, %v794_v31, 0  ;;  %v861_v37 = vld [vmem:[#allocation4] ss:$24 sps:$4 sm:$0xff]  }
  0x2f   :  { %783 = vmatmul.mubr.msk.bf16.vlgmr.msra.gmra.mrb[0].mxu0 %vm143_vm0, %v70_v12  ;;  %784 = vmatmul.mubr.msk.bf16.vlgmr.msra.gmra.mrb[0].mxu1 %vm143_vm0, %v70_v12  ;;  %v866_v36 = vld [vmem:[#allocation4 + $0xc] ss:$24 sps:$4 sm:$0xff]   ;;  %v864_v38 = vld [vmem:[#allocation4 + $0x8] ss:$24 sps:$4 sm:$0xff]   ;;  %v872_v40 = vld [vmem:[#allocation4 + $0x3c] ss:$24 sps:$4 sm:$0xff]  }
  0x30   :  { %230 = vmatpush1.bf16.msra.mxu0 %v840_v10  ;;  %339 = vmatpush1.bf16.msra.mxu1 %v843_v13  ;;  %v333_v35 = vsel %vm319_vm1, %v796_v32, 0  ;;  %v867_v41 = vld [vmem:[#allocation4 + $0x30] ss:$24 sps:$4 sm:$0xff]   ;;  %v461_v43 = vld [vmem:[%s1116_s2] sm:$0xff]  ;;  %v875_v44 = vld [vmem:[#allocation4 + $0x14] ss:$24 sps:$4 sm:$0xff]  }
  0x31   :  { %231 = vmatprep.subr.bf16.mxu0 %v848_v15  ;;  %798 = vmatprep.subr.msk.bf16.mxu1 %vm319_vm1, %v793_v17  ;;  %v870_v42 = vld [vmem:[#allocation4 + $0x38] ss:$24 sps:$4 sm:$0xff]   ;;  %v462_v45 = vpack.c.bf16 %v461_v43, %v461_v43  ;;  %v878_v47 = vld [vmem:[#allocation4 + $0x44] ss:$24 sps:$4 sm:$0xff]   ;;  %v671_v17 = vsub.s32 0, %v1094_v4  ;;  %v679_v20 = vsub.s32 2, %v1094_v4 }
  0x32   :  { %261 = vmatprep.mubr.bf16.mxu0 %v955_v0  ;;  %370 = vmatprep.mubr.bf16.mxu1 %v955_v0  ;;  %v873_v46 = vld [vmem:[#allocation4 + $0x10] ss:$24 sps:$4 sm:$0xff]   ;;  %v876_v48 = vld [vmem:[#allocation4 + $0x40] ss:$24 sps:$4 sm:$0xff]   ;;  %v683_v25 = vsub.s32 3, %v1094_v4 }
  0x33   :  { %v667_v18 = vld [vmem:[%s1120_s6] sm:$0x3f] }
  0x34   :  { %232 = vmatpush1.bf16.msra.mxu0 %v846_v19  ;;  %341 = vmatpush1.bf16.msra.mxu1 %v321_v22  ;;  %v675_v19 = vsub.s32 1, %v1094_v4 }
  0x35   :  { %379 = vmatprep.subr.bf16.mxu0 %v853_v21  ;;  %420 = vmatprep.subr.bf16.mxu1 %v856_v23  ;;  %v672_v21 = vrot.slane %v667_v18, %v671_v17 }
  0x36   :  { %v676_v24 = vrot.slane %v667_v18, %v675_v19 }
  0x37   :  { %785 = vmatmul.mubr.msk.bf16.vlgmr.msra.gmra.mrb[4].mxu0 %vm143_vm0, %v70_v12  ;;  %799 = vmatmul.mubr.msk.bf16.vlgmr.msra.gmra.mrb[4].mxu1 %vm315_vm2, %v59_v26 }
  0x38   :  { %380 = vmatpush1.bf16.msra.mxu0 %v851_v27  ;;  %421 = vmatpush1.bf16.msra.mxu1 %v854_v28 }
  0x39   :  { %800 = vmatprep.subr.msk.bf16.mxu0 %vm319_vm1, %v795_v29  ;;  %802 = vmatprep.subr.msk.bf16.mxu1 %vm319_vm1, %v797_v30  ;;  %v680_v30 = vrot.slane %v667_v18, %v679_v20 }
  0x3a   :  { %411 = vmatprep.mubr.bf16.mxu0 %v955_v0  ;;  %452 = vmatprep.mubr.bf16.mxu1 %v955_v0 }
  0x3c   :  { %382 = vmatpush1.bf16.msra.mxu0 %v327_v34  ;;  %423 = vmatpush1.bf16.msra.mxu1 %v333_v35 }
  0x3d   :  { %538 = vmatprep.subr.bf16.mxu0 %v863_v33  ;;  %579 = vmatprep.subr.bf16.mxu1 %v866_v36 }
  0x3f   :  { %801 = vmatmul.mubr.msk.bf16.vlgmr.msra.gmra.mrb[8].mxu0 %vm315_vm2, %v59_v26  ;;  %803 = vmatmul.mubr.msk.bf16.vlgmr.msra.gmra.mrb[8].mxu1 %vm315_vm2, %v59_v26 }
  0x40   :  { %539 = vmatpush1.bf16.msra.mxu0 %v861_v37  ;;  %580 = vmatpush1.bf16.msra.mxu1 %v864_v38 }
  0x41   :  { %540 = vmatprep.subr.bf16.mxu0 %v869_v39  ;;  %581 = vmatprep.subr.bf16.mxu1 %v872_v40  ;;  %v684_v39 = vrot.slane %v667_v18, %v683_v25 }
  0x42   :  { %570 = vmatprep.mubr.bf16.mxu0 %v955_v0  ;;  %611 = vmatprep.mubr.bf16.mxu1 %v955_v0 }
  0x44   :  { %541 = vmatpush1.bf16.msra.mxu0 %v867_v41  ;;  %582 = vmatpush1.bf16.msra.mxu1 %v870_v42 }
  0x45   :  { %620 = vmatprep.subr.bf16.mxu0 %v875_v44 }
  0x47   :  { %816 = vmatmul.mubr.msk.bf16.vlgmr.msra.gmra.mrb[12].mxu0 %vm143_vm0, %v462_v45  ;;  %817 = vmatmul.mubr.msk.bf16.vlgmr.msra.gmra.mrb[12].mxu1 %vm143_vm0, %v462_v45 }
  0x48   :  { %621 = vmatpush1.bf16.msra.mxu0 %v873_v46  ;;  %652 = vmatprep.mubr.bf16.mxu0 %v955_v0 }
  0x49   :  { %622 = vmatprep.subr.bf16.mxu0 %v878_v47 }
  0x4c   :  { %623 = vmatpush1.bf16.msra.mxu0 %v876_v48 }
  0x4f   :  { %818 = vmatmul.mubr.msk.bf16.vlgmr.msra.gmra.mrb[16].mxu0 %vm143_vm0, %v462_v45 }
 0x102   :  { %v181_v49 = vpop.f32.mrb[0].mxu0  ;;  %v222_v50 = vpop.f32.mrb[0].mxu1 }
 0x103   :  { %v183_v51 = vpop.f32.mrb[1].mxu0  ;;  %v224_v52 = vpop.f32.mrb[1].mxu1 }
 0x104   :  { %v185_v53 = vpop.f32.mrb[2].mxu0  ;;  %v226_v54 = vpop.f32.mrb[2].mxu1 }
 0x105   :  { %v186_v55 = vpop.f32.mrb[3].mxu0  ;;  %v227_v56 = vpop.f32.mrb[3].mxu1 }
 0x106   :  { %v687_v56 = vsub.s32 4, %v1094_v4 }
 0x10a   :  { %v263_v57 = vpop.f32.mrb[4].mxu0  ;;  %v372_v58 = vpop.f32.mrb[4].mxu1 }
 0x10b   :  { %v373_v59 = vadd.f32 %v372_v58, %v181_v49  ;;  %v265_v60 = vpop.f32.mrb[5].mxu0  ;;  %v374_v61 = vpop.f32.mrb[5].mxu1  ;;  %v729_v58 = vld [vmem:[%s1121_s7] sm:$0x3] }
 0x10c   :  { %v375_v62 = vadd.f32 %v374_v61, %v183_v51  ;;  %v267_v63 = vpop.f32.mrb[6].mxu0  ;;  %v376_v0 = vpop.f32.mrb[6].mxu1 }
 0x10d   :  { %v268_v1 = vpop.f32.mrb[7].mxu0  ;;  %v377_v2 = vpop.f32.mrb[7].mxu1  ;;  %v734_v63 = vrot.slane %v729_v58, %v671_v17 }
 0x10e   :  { %v738_v2 = vrot.slane %v729_v58, %v675_v19 }
 0x112   :  { %v413_v5 = vpop.f32.mrb[8].mxu0  ;;  %v454_v6 = vpop.f32.mrb[8].mxu1 }
 0x113   :  { %v414_v7 = vadd.f32 %v413_v5, %v222_v50  ;;  %v455_v8 = vadd.f32 %v454_v6, %v263_v57  ;;  %v415_v9 = vpop.f32.mrb[9].mxu0  ;;  %v456_v10 = vpop.f32.mrb[9].mxu1 }
 0x114   :  { %v416_v11 = vadd.f32 %v415_v9, %v224_v52  ;;  %v457_v12 = vadd.f32 %v456_v10, %v265_v60  ;;  %v417_v13 = vpop.f32.mrb[10].mxu0  ;;  %v458_v14 = vpop.f32.mrb[10].mxu1 }
 0x115   :  { %v418_v15 = vpop.f32.mrb[11].mxu0  ;;  %v459_v16 = vpop.f32.mrb[11].mxu1 }
 0x11a   :  { %v572_v22 = vpop.f32.mrb[12].mxu0  ;;  %v613_v23 = vpop.f32.mrb[12].mxu1 }
 0x11b   :  { %v661_v26 = vadd.f32 %v572_v22, %v373_v59  ;;  %v663_v27 = vadd.f32 %v613_v23, %v414_v7  ;;  %v574_v28 = vpop.f32.mrb[13].mxu0  ;;  %v615_v29 = vpop.f32.mrb[13].mxu1  ;;  %v691_v59 = vsub.s32 5, %v1094_v4 }
 0x11c   :  { %v662_v31 = vadd.f32 %v574_v28, %v375_v62  ;;  %v664_v32 = vadd.f32 %v615_v29, %v416_v11  ;;  %v576_v33 = vpop.f32.mrb[14].mxu0  ;;  %v617_v34 = vpop.f32.mrb[14].mxu1  ;;  %v688_v62 = vrot.slane %v667_v18, %v687_v56 }
 0x11d   :  { %v699_v35 = vadd.f32 %v672_v21, %v661_v26  ;;  %v577_v36 = vpop.f32.mrb[15].mxu0  ;;  %v618_v37 = vpop.f32.mrb[15].mxu1  ;;  %v701_v41 = vadd.f32 %v680_v30, %v663_v27  ;;  %v692_v1 = vrot.slane %v667_v18, %v691_v59 }
 0x11e   :  { %v700_v38 = vadd.f32 %v676_v24, %v662_v31  ;;  %v702_v43 = vadd.f32 %v684_v39, %v664_v32 }
 0x11f   :  { %v819_v40 = vmul.f32 -1.442695, %v699_v35  ;;  %v821_v47 = vmul.f32 -1.442695, %v701_v41 }
 0x120   :  { %v820_v42 = vmul.f32 -1.442695, %v700_v38  ;;  %v822_v51 = vmul.f32 -1.442695, %v702_v43 }
 0x121   :  { %879 = vpow2.f32 %v819_v40 }
 0x122   :  { %v654_v44 = vpop.f32.mrb[16].mxu0  ;;  %881 = vpow2.f32 %v820_v42 }
 0x123   :  { %v665_v45 = vadd.f32 %v654_v44, %v455_v8  ;;  %v656_v46 = vpop.f32.mrb[17].mxu0  ;;  %883 = vpow2.f32 %v821_v47 }
 0x124   :  { %v666_v48 = vadd.f32 %v656_v46, %v457_v12  ;;  %v658_v49 = vpop.f32.mrb[18].mxu0  ;;  %885 = vpow2.f32 %v822_v51 }
 0x125   :  { %v659_v50 = vpop.f32.mrb[19].mxu0  ;;  %v703_v5 = vadd.f32 %v688_v62, %v665_v45 }
 0x126   :  { %v704_v9 = vadd.f32 %v692_v1, %v666_v48 }
 0x12b   :  { %v880_v52 = vpop.eup %879 }
 0x12c   :  { %v711_v53 = vadd.f32 1.0, %v880_v52  ;;  %v882_v54 = vpop.eup %881 }
 0x12d   :  { %v712_v55 = vadd.f32 1.0, %v882_v54  ;;  %v884_v57 = vpop.eup %883 }
 0x12e   :  { %887 = vrcp.f32 %v711_v53  ;;  %v886_v60 = vpop.eup %885  ;;  %v723_v61 = vadd.f32 1.0, %v884_v57 }
 0x12f   :  { %889 = vrcp.f32 %v712_v55  ;;  %v724_v0 = vadd.f32 1.0, %v886_v60 }
 0x130   :  { %891 = vrcp.f32 %v723_v61 }
 0x131   :  { %893 = vrcp.f32 %v724_v0 }
 0x138   :  { %v888_v3 = vpop.eup %887 }
 0x139   :  { %v741_v6 = vmul.f32 %v888_v3, %v734_v63  ;;  %v890_v7 = vpop.eup %889 }
 0x13a   :  { %v742_v10 = vmul.f32 %v890_v7, %v738_v2  ;;  %v892_v4 = vpop.eup %891 }
 0x13b   :  { %v743_v8 = vadd.f32 %v741_v6, %v703_v5  ;;  %v894_v12 = vpop.eup %893  ;;  %v747_v13 = vsub.f32 1.0, %v892_v4 }
 0x13c   :  { %v744_v11 = vadd.f32 %v742_v10, %v704_v9  ;;  %v748_v16 = vsub.f32 1.0, %v894_v12 }
 0x13d   :  { %895 = vtanh.f32 %v743_v8 }
 0x13e   :  { %897 = vtanh.f32 %v744_v11 }
 0x147   :  { %v896_v14 = vpop.eup %895 }
 0x148   :  { %v749_v15 = vmul.f32 %v896_v14, %v747_v13  ;;  %v898_v17 = vpop.eup %897 }
 0x149   :  { %v750_v19 = vmul.f32 %v898_v17, %v748_v16 }
 0x14a   :  { %v751_v18 = vmul.f32 %v749_v15, %v749_v15 }
 0x14b   :  { %v752_v20 = vmul.f32 %v750_v19, %v750_v19 }
 0x14c   :  { %753 = vadd.xlane.f32.xlu0 %v751_v18 }
 0x150   :  { %757 = vadd.xlane.f32.xlu0 %v752_v20 }
 0x1d9   :  { %v754_v21 = vpop.xlane.xlu0 %753 }
 0x1da   :  { %v755_v22 = vmax.f32 %v754_v21, 1e-24 }
 0x1dc   :  { %899 = vrsqrt.f32 %v755_v22 }
 0x1dd   :  { %v758_v23 = vpop.xlane.xlu0 %757 }
 0x1de   :  { %v759_v24 = vmax.f32 %v758_v23, 1e-24 }
 0x1e0   :  { %901 = vrsqrt.f32 %v759_v24 }
 0x1e6   :  { %v900_v25 = vpop.eup %899 }
 0x1e7   :  { %v761_v26 = vmul.f32 %v900_v25, %v749_v15 }
 0x1e9   :  { %762 = vst [vmem:[%s1122_s8] sm:$0xff] %v761_v26 }
 0x1ea   :  { %v902_v27 = vpop.eup %901 }
 0x1eb   :  { %v763_v28 = vmul.f32 %v902_v27, %v750_v19 }
 0x1ed   :  { %764 = vst [vmem:[%s1122_s8 + $0x8] sm:$0xff] %v763_v28 }
 0x1ee   :  { %769 = vsyncpa [#allocation3], 1 }
 0x1ef   :  { %770 = vsyncpa [#allocation5], 1 }

</bundles_post_ra>
